<compile_context>
chip_gen: v7x
topology: tpu7x:2x2x1
jax: 0.10.0
libtpu: 0.0.40
codegen_flags: <defaults>
</compile_context>

<pallas_src>
import functools

import jax
import jax.numpy as jnp
import numpy as np
from jax import lax
from jax.experimental import pallas as pl
from jax.experimental.pallas import tpu as pltpu  # noqa: F401  (TPU backend)


# ----------------------------- Pallas kernel ------------------------------- #

def _layernorm(z, gamma, beta, eps=1e-5):
    # PyTorch nn.LayerNorm over the last (feature) axis, biased variance.
    mean = jnp.mean(z, axis=-1, keepdims=True)
    c = z - mean
    var = jnp.mean(c * c, axis=-1, keepdims=True)
    return c * lax.rsqrt(var + eps) * gamma + beta


def _mlp_lp_kernel(x_ref,
                   w0_ref, b0_ref, w1_ref, b1_ref, w2_ref, b2_ref,
                   src_ref, dst_ref,
                   pw1_ref, pb1_ref, g1_ref, be1_ref,
                   pw2_ref, pb2_ref, g2_ref, be2_ref,
                   pw3t_ref, pb3_ref,
                   o_ref, *, n_nodes):
    f32 = jnp.float32

    # ---- encoder: Linear -> ReLU -> Linear -> ReLU -> Linear (no final ReLU) ----
    h = x_ref[...]
    h = jnp.maximum(jnp.dot(h, w0_ref[...], preferred_element_type=f32) + b0_ref[...], 0.0)
    h = jnp.maximum(jnp.dot(h, w1_ref[...], preferred_element_type=f32) + b1_ref[...], 0.0)
    h = jnp.dot(h, w2_ref[...], preferred_element_type=f32) + b2_ref[...]

    # ---- in-kernel edge-endpoint gather (pos+neg packed) via one-hot matmuls ----
    n_edges = o_ref.shape[0]                                        # 2E
    col = lax.broadcasted_iota(jnp.int32, (n_edges, n_nodes), 1)
    oh_src = (col == src_ref[...]).astype(f32)                      # (2E, N)
    oh_dst = (col == dst_ref[...]).astype(f32)
    h_src = jnp.dot(oh_src, h, preferred_element_type=f32)          # (2E, H)
    h_dst = jnp.dot(oh_dst, h, preferred_element_type=f32)
    e = h_src * h_dst

    # ---- predictor: Linear -> LayerNorm -> ReLU (x2) -> Linear(H, 1) ----
    z = jnp.dot(e, pw1_ref[...], preferred_element_type=f32) + pb1_ref[...]
    z = jnp.maximum(_layernorm(z, g1_ref[...], be1_ref[...]), 0.0)
    z = jnp.dot(z, pw2_ref[...], preferred_element_type=f32) + pb2_ref[...]
    z = jnp.maximum(_layernorm(z, g2_ref[...], be2_ref[...]), 0.0)
    # final H->1 projection as a lane reduction (w3 passed transposed as (1, H))
    out = jnp.sum(z * pw3t_ref[...], axis=-1, keepdims=True) + pb3_ref[...]
    o_ref[...] = out.astype(o_ref.dtype)


# ------------------------------ wrapper ------------------------------------ #

def mlp_link_predict(x, layer_params, pred_params, pos_edges, neg_edges):
    """Fused forward pass. Returns (h_pos, h_neg), each (E, 1)."""
    n_nodes, _ = x.shape
    (w0, b0), (w1, b1), (w2, b2) = layer_params
    (pw1, pb1), (g1, be1), (pw2, pb2), (g2, be2), (pw3, pb3) = pred_params

    pos_src, pos_dst = pos_edges
    neg_src, neg_dst = neg_edges
    n_e = int(pos_src.shape[0])
    src = jnp.concatenate([pos_src, neg_src]).astype(jnp.int32).reshape(2 * n_e, 1)
    dst = jnp.concatenate([pos_dst, neg_dst]).astype(jnp.int32).reshape(2 * n_e, 1)
    pw3t = pw3.reshape(1, -1)          # (1, H) so the last projection is lane-dense

    args = (x, w0, b0, w1, b1, w2, b2, src, dst,
            pw1, pb1, g1, be1, pw2, pb2, g2, be2, pw3t, pb3)

    def full_spec(a):
        nd = a.ndim
        return pl.BlockSpec(a.shape, lambda i, nd=nd: (0,) * nd)

    out = pl.pallas_call(
        functools.partial(_mlp_lp_kernel, n_nodes=n_nodes),
        out_shape=jax.ShapeDtypeStruct((2 * n_e, 1), jnp.float32),
        grid=(1,),
        in_specs=[full_spec(a) for a in args],
        out_specs=pl.BlockSpec((2 * n_e, 1), lambda i: (0, 0)),
    )(*args)
    return out[:n_e], out[n_e:]


# --------------------------- pure-JAX reference ----------------------------- #

def reference_forward(x, layer_params, pred_params, pos_edges, neg_edges):
    (w0, b0), (w1, b1), (w2, b2) = layer_params
    (pw1, pb1), (g1, be1), (pw2, pb2), (g2, be2), (pw3, pb3) = pred_params

    h = jnp.maximum(x @ w0 + b0, 0.0)
    h = jnp.maximum(h @ w1 + b1, 0.0)
    h = h @ w2 + b2

    def ln(z, g, b, eps=1e-5):
        m = z.mean(-1, keepdims=True)
        v = ((z - m) ** 2).mean(-1, keepdims=True)
        return (z - m) / jnp.sqrt(v + eps) * g + b

    def pred(e):
        z = jnp.maximum(ln(e @ pw1 + pb1, g1, be1), 0.0)
        z = jnp.maximum(ln(z @ pw2 + pb2, g2, be2), 0.0)
        return z @ pw3 + pb3

    ps, pd = pos_edges
    ns, nd = neg_edges
    return pred(h[ps] * h[pd]), pred(h[ns] * h[nd])


# ------------------------------- main --------------------------------------- #

if __name__ == "__main__":
    key = jax.random.PRNGKey(0)

    N = 64          # number of nodes
    IN_SIZE = 16
    HID = 32
    E = 16          # positive / negative edges each  (2E = 32, multiple of 8)

    keys = jax.random.split(key, 16)

    # node features
    x = jax.random.normal(keys[0], (N, IN_SIZE), dtype=jnp.float32)

    def lin_init(k, din, dout):
        kw, kb = jax.random.split(k)
        w = jax.random.normal(kw, (din, dout), dtype=jnp.float32) * (1.0 / np.sqrt(din))
        b = jax.random.normal(kb, (1, dout), dtype=jnp.float32) * 0.01
        return w, b

    # encoder: Linear(IN,HID) -> Linear(HID,HID) -> Linear(HID,HID)
    layer_params = [lin_init(keys[1], IN_SIZE, HID),
                    lin_init(keys[2], HID, HID),
                    lin_init(keys[3], HID, HID)]

    # predictor: Linear -> LayerNorm -> ReLU -> Linear -> LayerNorm -> ReLU -> Linear(HID,1)
    def ln_init(k, d):
        # nn.LayerNorm default init is gamma=1, beta=0; perturb slightly so the
        # affine part is actually exercised by the test.
        kg, kb = jax.random.split(k)
        g = 1.0 + 0.1 * jax.random.normal(kg, (1, d), dtype=jnp.float32)
        b = 0.1 * jax.random.normal(kb, (1, d), dtype=jnp.float32)
        return g, b

    pred_params = (
        lin_init(keys[4], HID, HID),
        ln_init(keys[5], HID),
        lin_init(keys[6], HID, HID),
        ln_init(keys[7], HID),
        lin_init(keys[8], HID, 1),
    )

    # positive / negative edge endpoints
    pos_src = jax.random.randint(keys[9], (E,), 0, N)
    pos_dst = jax.random.randint(keys[10], (E,), 0, N)
    neg_src = jax.random.randint(keys[11], (E,), 0, N)
    neg_dst = jax.random.randint(keys[12], (E,), 0, N)

    # NOTE: the PyTorch forward() receives `blocks` but (being an MLP baseline)
    # never uses them in the layer application, so no adjacency is needed here.
    h_pos, h_neg = mlp_link_predict(x, layer_params, pred_params,
                                    (pos_src, pos_dst), (neg_src, neg_dst))
    jax.block_until_ready((h_pos, h_neg))

    r_pos, r_neg = reference_forward(x, layer_params, pred_params,
                                     (pos_src, pos_dst), (neg_src, neg_dst))
    np.testing.assert_allclose(np.asarray(h_pos), np.asarray(r_pos), rtol=1e-4, atol=1e-4)
    np.testing.assert_allclose(np.asarray(h_neg), np.asarray(r_neg), rtol=1e-4, atol=1e-4)

    assert h_pos.shape == (E, 1) and h_neg.shape == (E, 1)
    # TODO(synk): MLP.inference() (DGL DataLoader + layer-wise full-graph sweep)
    # is a host-side data pipeline with no Pallas equivalent; not implemented.
    print("KERNEL_OK")
</pallas_src>

<mosaic_0001>
module attributes {stable_mosaic.version = 11 : i64} {
  func.func @_mlp_lp_kernel(%arg0: i32, %arg1: memref<64x16xf32, #tpu.memory_space<vmem>>, %arg2: memref<16x32xf32, #tpu.memory_space<vmem>>, %arg3: memref<1x32xf32, #tpu.memory_space<vmem>>, %arg4: memref<32x32xf32, #tpu.memory_space<vmem>>, %arg5: memref<1x32xf32, #tpu.memory_space<vmem>>, %arg6: memref<32x32xf32, #tpu.memory_space<vmem>>, %arg7: memref<1x32xf32, #tpu.memory_space<vmem>>, %arg8: memref<32x1xi32, #tpu.memory_space<vmem>>, %arg9: memref<32x1xi32, #tpu.memory_space<vmem>>, %arg10: memref<32x32xf32, #tpu.memory_space<vmem>>, %arg11: memref<1x32xf32, #tpu.memory_space<vmem>>, %arg12: memref<1x32xf32, #tpu.memory_space<vmem>>, %arg13: memref<1x32xf32, #tpu.memory_space<vmem>>, %arg14: memref<32x32xf32, #tpu.memory_space<vmem>>, %arg15: memref<1x32xf32, #tpu.memory_space<vmem>>, %arg16: memref<1x32xf32, #tpu.memory_space<vmem>>, %arg17: memref<1x32xf32, #tpu.memory_space<vmem>>, %arg18: memref<1x32xf32, #tpu.memory_space<vmem>>, %arg19: memref<1x1xf32, #tpu.memory_space<vmem>>, %arg20: memref<32x1xf32, #tpu.memory_space<vmem>>) attributes {dimension_semantics = [#tpu.dimension_semantics<arbitrary>], iteration_bounds = array<i64: 1>, scalar_prefetch = 0 : i64, scratch_operands = 0 : i64, tpu.core_type = #tpu.core_type<tc>, window_params = [{pipeline_mode = #tpu.pipeline_mode<synchronous>, transform_indices = @transform_0, window_bounds = array<i64: 64, 16>}, {pipeline_mode = #tpu.pipeline_mode<synchronous>, transform_indices = @transform_1, window_bounds = array<i64: 16, 32>}, {pipeline_mode = #tpu.pipeline_mode<synchronous>, transform_indices = @transform_2, window_bounds = array<i64: 1, 32>}, {pipeline_mode = #tpu.pipeline_mode<synchronous>, transform_indices = @transform_3, window_bounds = array<i64: 32, 32>}, {pipeline_mode = #tpu.pipeline_mode<synchronous>, transform_indices = @transform_4, window_bounds = array<i64: 1, 32>}, {pipeline_mode = #tpu.pipeline_mode<synchronous>, transform_indices = @transform_5, window_bounds = array<i64: 32, 32>}, {pipeline_mode = #tpu.pipeline_mode<synchronous>, transform_indices = @transform_6, window_bounds = array<i64: 1, 32>}, {pipeline_mode = #tpu.pipeline_mode<synchronous>, transform_indices = @transform_7, window_bounds = array<i64: 32, 1>}, {pipeline_mode = #tpu.pipeline_mode<synchronous>, transform_indices = @transform_8, window_bounds = array<i64: 32, 1>}, {pipeline_mode = #tpu.pipeline_mode<synchronous>, transform_indices = @transform_9, window_bounds = array<i64: 32, 32>}, {pipeline_mode = #tpu.pipeline_mode<synchronous>, transform_indices = @transform_10, window_bounds = array<i64: 1, 32>}, {pipeline_mode = #tpu.pipeline_mode<synchronous>, transform_indices = @transform_11, window_bounds = array<i64: 1, 32>}, {pipeline_mode = #tpu.pipeline_mode<synchronous>, transform_indices = @transform_12, window_bounds = array<i64: 1, 32>}, {pipeline_mode = #tpu.pipeline_mode<synchronous>, transform_indices = @transform_13, window_bounds = array<i64: 32, 32>}, {pipeline_mode = #tpu.pipeline_mode<synchronous>, transform_indices = @transform_14, window_bounds = array<i64: 1, 32>}, {pipeline_mode = #tpu.pipeline_mode<synchronous>, transform_indices = @transform_15, window_bounds = array<i64: 1, 32>}, {pipeline_mode = #tpu.pipeline_mode<synchronous>, transform_indices = @transform_16, window_bounds = array<i64: 1, 32>}, {pipeline_mode = #tpu.pipeline_mode<synchronous>, transform_indices = @transform_17, window_bounds = array<i64: 1, 32>}, {pipeline_mode = #tpu.pipeline_mode<synchronous>, transform_indices = @transform_18, window_bounds = array<i64: 1, 1>}, {pipeline_mode = #tpu.pipeline_mode<synchronous>, transform_indices = @transform_19, window_bounds = array<i64: 32, 1>}]} {
    %c0 = arith.constant 0 : index
    %c0_0 = arith.constant 0 : index
    %0 = vector.load %arg1[%c0, %c0_0] : memref<64x16xf32, #tpu.memory_space<vmem>>, vector<64x16xf32>
    %c0_1 = arith.constant 0 : index
    %c0_2 = arith.constant 0 : index
    %1 = vector.load %arg2[%c0_1, %c0_2] : memref<16x32xf32, #tpu.memory_space<vmem>>, vector<16x32xf32>
    %cst = arith.constant dense<0.000000e+00> : vector<64x32xf32>
    %2 = tpu.matmul %0, %1, %cst {dimension_numbers = #tpu.dot_dimension_numbers<[1], [0], [0], [1], [0, 0, 1, 1], [], []>} : vector<64x16xf32>, vector<16x32xf32>, vector<64x32xf32> -> vector<64x32xf32>
    %c0_3 = arith.constant 0 : index
    %c0_4 = arith.constant 0 : index
    %3 = vector.load %arg3[%c0_3, %c0_4] : memref<1x32xf32, #tpu.memory_space<vmem>>, vector<1x32xf32>
    %4 = vector.broadcast %3 : vector<1x32xf32> to vector<64x32xf32>
    %5 = arith.addf %2, %4 : vector<64x32xf32>
    %cst_5 = arith.constant 0.000000e+00 : f32
    %6 = vector.broadcast %cst_5 : f32 to vector<64x32xf32>
    %7 = arith.maximumf %5, %6 : vector<64x32xf32>
    %c0_6 = arith.constant 0 : index
    %c0_7 = arith.constant 0 : index
    %8 = vector.load %arg4[%c0_6, %c0_7] : memref<32x32xf32, #tpu.memory_space<vmem>>, vector<32x32xf32>
    %cst_8 = arith.constant dense<0.000000e+00> : vector<64x32xf32>
    %9 = tpu.matmul %7, %8, %cst_8 {dimension_numbers = #tpu.dot_dimension_numbers<[1], [0], [0], [1], [0, 0, 1, 1], [], []>} : vector<64x32xf32>, vector<32x32xf32>, vector<64x32xf32> -> vector<64x32xf32>
    %c0_9 = arith.constant 0 : index
    %c0_10 = arith.constant 0 : index
    %10 = vector.load %arg5[%c0_9, %c0_10] : memref<1x32xf32, #tpu.memory_space<vmem>>, vector<1x32xf32>
    %11 = vector.broadcast %10 : vector<1x32xf32> to vector<64x32xf32>
    %12 = arith.addf %9, %11 : vector<64x32xf32>
    %cst_11 = arith.constant 0.000000e+00 : f32
    %13 = vector.broadcast %cst_11 : f32 to vector<64x32xf32>
    %14 = arith.maximumf %12, %13 : vector<64x32xf32>
    %c0_12 = arith.constant 0 : index
    %c0_13 = arith.constant 0 : index
    %15 = vector.load %arg6[%c0_12, %c0_13] : memref<32x32xf32, #tpu.memory_space<vmem>>, vector<32x32xf32>
    %cst_14 = arith.constant dense<0.000000e+00> : vector<64x32xf32>
    %16 = tpu.matmul %14, %15, %cst_14 {dimension_numbers = #tpu.dot_dimension_numbers<[1], [0], [0], [1], [0, 0, 1, 1], [], []>} : vector<64x32xf32>, vector<32x32xf32>, vector<64x32xf32> -> vector<64x32xf32>
    %c0_15 = arith.constant 0 : index
    %c0_16 = arith.constant 0 : index
    %17 = vector.load %arg7[%c0_15, %c0_16] : memref<1x32xf32, #tpu.memory_space<vmem>>, vector<1x32xf32>
    %18 = vector.broadcast %17 : vector<1x32xf32> to vector<64x32xf32>
    %19 = arith.addf %16, %18 : vector<64x32xf32>
    %20 = tpu.iota {dimensions = array<i32: 1>} : vector<32x64xi32>
    %c0_17 = arith.constant 0 : index
    %c0_18 = arith.constant 0 : index
    %21 = vector.load %arg8[%c0_17, %c0_18] : memref<32x1xi32, #tpu.memory_space<vmem>>, vector<32x1xi32>
    %22 = vector.broadcast %21 : vector<32x1xi32> to vector<32x64xi32>
    %23 = arith.cmpi eq, %20, %22 : vector<32x64xi32>
    %24 = arith.extui %23 : vector<32x64xi1> to vector<32x64xi32>
    %25 = arith.sitofp %24 : vector<32x64xi32> to vector<32x64xf32>
    %c0_19 = arith.constant 0 : index
    %c0_20 = arith.constant 0 : index
    %26 = vector.load %arg9[%c0_19, %c0_20] : memref<32x1xi32, #tpu.memory_space<vmem>>, vector<32x1xi32>
    %27 = vector.broadcast %26 : vector<32x1xi32> to vector<32x64xi32>
    %28 = arith.cmpi eq, %20, %27 : vector<32x64xi32>
    %29 = arith.extui %28 : vector<32x64xi1> to vector<32x64xi32>
    %30 = arith.sitofp %29 : vector<32x64xi32> to vector<32x64xf32>
    %cst_21 = arith.constant dense<0.000000e+00> : vector<32x32xf32>
    %31 = tpu.matmul %25, %19, %cst_21 {dimension_numbers = #tpu.dot_dimension_numbers<[1], [0], [0], [1], [0, 0, 1, 1], [], []>} : vector<32x64xf32>, vector<64x32xf32>, vector<32x32xf32> -> vector<32x32xf32>
    %cst_22 = arith.constant dense<0.000000e+00> : vector<32x32xf32>
    %32 = tpu.matmul %30, %19, %cst_22 {dimension_numbers = #tpu.dot_dimension_numbers<[1], [0], [0], [1], [0, 0, 1, 1], [], []>} : vector<32x64xf32>, vector<64x32xf32>, vector<32x32xf32> -> vector<32x32xf32>
    %33 = arith.mulf %31, %32 : vector<32x32xf32>
    %c0_23 = arith.constant 0 : index
    %c0_24 = arith.constant 0 : index
    %34 = vector.load %arg10[%c0_23, %c0_24] : memref<32x32xf32, #tpu.memory_space<vmem>>, vector<32x32xf32>
    %cst_25 = arith.constant dense<0.000000e+00> : vector<32x32xf32>
    %35 = tpu.matmul %33, %34, %cst_25 {dimension_numbers = #tpu.dot_dimension_numbers<[1], [0], [0], [1], [0, 0, 1, 1], [], []>} : vector<32x32xf32>, vector<32x32xf32>, vector<32x32xf32> -> vector<32x32xf32>
    %c0_26 = arith.constant 0 : index
    %c0_27 = arith.constant 0 : index
    %36 = vector.load %arg11[%c0_26, %c0_27] : memref<1x32xf32, #tpu.memory_space<vmem>>, vector<1x32xf32>
    %37 = vector.broadcast %36 : vector<1x32xf32> to vector<32x32xf32>
    %38 = arith.addf %35, %37 : vector<32x32xf32>
    %c0_28 = arith.constant 0 : index
    %c0_29 = arith.constant 0 : index
    %39 = vector.load %arg12[%c0_28, %c0_29] : memref<1x32xf32, #tpu.memory_space<vmem>>, vector<1x32xf32>
    %c0_30 = arith.constant 0 : index
    %c0_31 = arith.constant 0 : index
    %40 = vector.load %arg13[%c0_30, %c0_31] : memref<1x32xf32, #tpu.memory_space<vmem>>, vector<1x32xf32>
    %cst_32 = arith.constant dense<0.000000e+00> : vector<32xf32>
    %41 = vector.multi_reduction <add>, %38, %cst_32 [1] : vector<32x32xf32> to vector<32xf32>
    %42 = vector.shape_cast %41 : vector<32xf32> to vector<32x1xf32>
    %cst_33 = arith.constant 3.200000e+01 : f32
    %43 = vector.broadcast %cst_33 : f32 to vector<32x1xf32>
    %44 = arith.divf %42, %43 : vector<32x1xf32>
    %45 = vector.broadcast %44 : vector<32x1xf32> to vector<32x32xf32>
    %46 = arith.subf %38, %45 : vector<32x32xf32>
    %47 = arith.mulf %46, %46 : vector<32x32xf32>
    %cst_34 = arith.constant dense<0.000000e+00> : vector<32xf32>
    %48 = vector.multi_reduction <add>, %47, %cst_34 [1] : vector<32x32xf32> to vector<32xf32>
    %49 = vector.shape_cast %48 : vector<32xf32> to vector<32x1xf32>
    %cst_35 = arith.constant 3.200000e+01 : f32
    %50 = vector.broadcast %cst_35 : f32 to vector<32x1xf32>
    %51 = arith.divf %49, %50 : vector<32x1xf32>
    %cst_36 = arith.constant 9.99999974E-6 : f32
    %52 = vector.broadcast %cst_36 : f32 to vector<32x1xf32>
    %53 = arith.addf %51, %52 : vector<32x1xf32>
    %54 = math.rsqrt %53 : vector<32x1xf32>
    %55 = vector.broadcast %54 : vector<32x1xf32> to vector<32x32xf32>
    %56 = arith.mulf %46, %55 : vector<32x32xf32>
    %57 = vector.broadcast %39 : vector<1x32xf32> to vector<32x32xf32>
    %58 = arith.mulf %56, %57 : vector<32x32xf32>
    %59 = vector.broadcast %40 : vector<1x32xf32> to vector<32x32xf32>
    %60 = arith.addf %58, %59 : vector<32x32xf32>
    %cst_37 = arith.constant 0.000000e+00 : f32
    %61 = vector.broadcast %cst_37 : f32 to vector<32x32xf32>
    %62 = arith.maximumf %60, %61 : vector<32x32xf32>
    %c0_38 = arith.constant 0 : index
    %c0_39 = arith.constant 0 : index
    %63 = vector.load %arg14[%c0_38, %c0_39] : memref<32x32xf32, #tpu.memory_space<vmem>>, vector<32x32xf32>
    %cst_40 = arith.constant dense<0.000000e+00> : vector<32x32xf32>
    %64 = tpu.matmul %62, %63, %cst_40 {dimension_numbers = #tpu.dot_dimension_numbers<[1], [0], [0], [1], [0, 0, 1, 1], [], []>} : vector<32x32xf32>, vector<32x32xf32>, vector<32x32xf32> -> vector<32x32xf32>
    %c0_41 = arith.constant 0 : index
    %c0_42 = arith.constant 0 : index
    %65 = vector.load %arg15[%c0_41, %c0_42] : memref<1x32xf32, #tpu.memory_space<vmem>>, vector<1x32xf32>
    %66 = vector.broadcast %65 : vector<1x32xf32> to vector<32x32xf32>
    %67 = arith.addf %64, %66 : vector<32x32xf32>
    %c0_43 = arith.constant 0 : index
    %c0_44 = arith.constant 0 : index
    %68 = vector.load %arg16[%c0_43, %c0_44] : memref<1x32xf32, #tpu.memory_space<vmem>>, vector<1x32xf32>
    %c0_45 = arith.constant 0 : index
    %c0_46 = arith.constant 0 : index
    %69 = vector.load %arg17[%c0_45, %c0_46] : memref<1x32xf32, #tpu.memory_space<vmem>>, vector<1x32xf32>
    %cst_47 = arith.constant dense<0.000000e+00> : vector<32xf32>
    %70 = vector.multi_reduction <add>, %67, %cst_47 [1] : vector<32x32xf32> to vector<32xf32>
    %71 = vector.shape_cast %70 : vector<32xf32> to vector<32x1xf32>
    %cst_48 = arith.constant 3.200000e+01 : f32
    %72 = vector.broadcast %cst_48 : f32 to vector<32x1xf32>
    %73 = arith.divf %71, %72 : vector<32x1xf32>
    %74 = vector.broadcast %73 : vector<32x1xf32> to vector<32x32xf32>
    %75 = arith.subf %67, %74 : vector<32x32xf32>
    %76 = arith.mulf %75, %75 : vector<32x32xf32>
    %cst_49 = arith.constant dense<0.000000e+00> : vector<32xf32>
    %77 = vector.multi_reduction <add>, %76, %cst_49 [1] : vector<32x32xf32> to vector<32xf32>
    %78 = vector.shape_cast %77 : vector<32xf32> to vector<32x1xf32>
    %cst_50 = arith.constant 3.200000e+01 : f32
    %79 = vector.broadcast %cst_50 : f32 to vector<32x1xf32>
    %80 = arith.divf %78, %79 : vector<32x1xf32>
    %cst_51 = arith.constant 9.99999974E-6 : f32
    %81 = vector.broadcast %cst_51 : f32 to vector<32x1xf32>
    %82 = arith.addf %80, %81 : vector<32x1xf32>
    %83 = math.rsqrt %82 : vector<32x1xf32>
    %84 = vector.broadcast %83 : vector<32x1xf32> to vector<32x32xf32>
    %85 = arith.mulf %75, %84 : vector<32x32xf32>
    %86 = vector.broadcast %68 : vector<1x32xf32> to vector<32x32xf32>
    %87 = arith.mulf %85, %86 : vector<32x32xf32>
    %88 = vector.broadcast %69 : vector<1x32xf32> to vector<32x32xf32>
    %89 = arith.addf %87, %88 : vector<32x32xf32>
    %cst_52 = arith.constant 0.000000e+00 : f32
    %90 = vector.broadcast %cst_52 : f32 to vector<32x32xf32>
    %91 = arith.maximumf %89, %90 : vector<32x32xf32>
    %c0_53 = arith.constant 0 : index
    %c0_54 = arith.constant 0 : index
    %92 = vector.load %arg18[%c0_53, %c0_54] : memref<1x32xf32, #tpu.memory_space<vmem>>, vector<1x32xf32>
    %93 = vector.broadcast %92 : vector<1x32xf32> to vector<32x32xf32>
    %94 = arith.mulf %91, %93 : vector<32x32xf32>
    %cst_55 = arith.constant dense<0.000000e+00> : vector<32xf32>
    %95 = vector.multi_reduction <add>, %94, %cst_55 [1] : vector<32x32xf32> to vector<32xf32>
    %96 = vector.shape_cast %95 : vector<32xf32> to vector<32x1xf32>
    %c0_56 = arith.constant 0 : index
    %c0_57 = arith.constant 0 : index
    %97 = vector.load %arg19[%c0_56, %c0_57] : memref<1x1xf32, #tpu.memory_space<vmem>>, vector<1x1xf32>
    %98 = vector.broadcast %97 : vector<1x1xf32> to vector<32x1xf32>
    %99 = arith.addf %96, %98 : vector<32x1xf32>
    %c0_58 = arith.constant 0 : index
    %c0_59 = arith.constant 0 : index
    %100 = vector.load %arg20[%c0_58, %c0_59] : memref<32x1xf32, #tpu.memory_space<vmem>>, vector<32x1xf32>
    tpu.vector_store %arg20[%c0_58, %c0_59], %99 {strides = array<i32>} : memref<32x1xf32, #tpu.memory_space<vmem>>, vector<32x1xf32>,
    return
  }
  func.func @transform_0(%arg0: i32) -> (i32, i32) {
    %c0_i32 = arith.constant 0 : i32
    %c0_i32_0 = arith.constant 0 : i32
    %c0_i32_1 = arith.constant 0 : i32
    return %c0_i32, %c0_i32_0 : i32, i32
  }
  func.func @transform_1(%arg0: i32) -> (i32, i32) {
    %c0_i32 = arith.constant 0 : i32
    %c0_i32_0 = arith.constant 0 : i32
    %c0_i32_1 = arith.constant 0 : i32
    return %c0_i32, %c0_i32_0 : i32, i32
  }
  func.func @transform_2(%arg0: i32) -> (i32, i32) {
    %c0_i32 = arith.constant 0 : i32
    %c0_i32_0 = arith.constant 0 : i32
    %c0_i32_1 = arith.constant 0 : i32
    return %c0_i32, %c0_i32_0 : i32, i32
  }
  func.func @transform_3(%arg0: i32) -> (i32, i32) {
    %c0_i32 = arith.constant 0 : i32
    %c0_i32_0 = arith.constant 0 : i32
    %c0_i32_1 = arith.constant 0 : i32
    return %c0_i32, %c0_i32_0 : i32, i32
  }
  func.func @transform_4(%arg0: i32) -> (i32, i32) {
    %c0_i32 = arith.constant 0 : i32
    %c0_i32_0 = arith.constant 0 : i32
    %c0_i32_1 = arith.constant 0 : i32
    return %c0_i32, %c0_i32_0 : i32, i32
  }
  func.func @transform_5(%arg0: i32) -> (i32, i32) {
    %c0_i32 = arith.constant 0 : i32
    %c0_i32_0 = arith.constant 0 : i32
    %c0_i32_1 = arith.constant 0 : i32
    return %c0_i32, %c0_i32_0 : i32, i32
  }
  func.func @transform_6(%arg0: i32) -> (i32, i32) {
    %c0_i32 = arith.constant 0 : i32
    %c0_i32_0 = arith.constant 0 : i32
    %c0_i32_1 = arith.constant 0 : i32
    return %c0_i32, %c0_i32_0 : i32, i32
  }
  func.func @transform_7(%arg0: i32) -> (i32, i32) {
    %c0_i32 = arith.constant 0 : i32
    %c0_i32_0 = arith.constant 0 : i32
    %c0_i32_1 = arith.constant 0 : i32
    return %c0_i32, %c0_i32_0 : i32, i32
  }
  func.func @transform_8(%arg0: i32) -> (i32, i32) {
    %c0_i32 = arith.constant 0 : i32
    %c0_i32_0 = arith.constant 0 : i32
    %c0_i32_1 = arith.constant 0 : i32
    return %c0_i32, %c0_i32_0 : i32, i32
  }
  func.func @transform_9(%arg0: i32) -> (i32, i32) {
    %c0_i32 = arith.constant 0 : i32
    %c0_i32_0 = arith.constant 0 : i32
    %c0_i32_1 = arith.constant 0 : i32
    return %c0_i32, %c0_i32_0 : i32, i32
  }
  func.func @transform_10(%arg0: i32) -> (i32, i32) {
    %c0_i32 = arith.constant 0 : i32
    %c0_i32_0 = arith.constant 0 : i32
    %c0_i32_1 = arith.constant 0 : i32
    return %c0_i32, %c0_i32_0 : i32, i32
  }
  func.func @transform_11(%arg0: i32) -> (i32, i32) {
    %c0_i32 = arith.constant 0 : i32
    %c0_i32_0 = arith.constant 0 : i32
    %c0_i32_1 = arith.constant 0 : i32
    return %c0_i32, %c0_i32_0 : i32, i32
  }
  func.func @transform_12(%arg0: i32) -> (i32, i32) {
    %c0_i32 = arith.constant 0 : i32
    %c0_i32_0 = arith.constant 0 : i32
    %c0_i32_1 = arith.constant 0 : i32
    return %c0_i32, %c0_i32_0 : i32, i32
  }
  func.func @transform_13(%arg0: i32) -> (i32, i32) {
    %c0_i32 = arith.constant 0 : i32
    %c0_i32_0 = arith.constant 0 : i32
    %c0_i32_1 = arith.constant 0 : i32
    return %c0_i32, %c0_i32_0 : i32, i32
  }
  func.func @transform_14(%arg0: i32) -> (i32, i32) {
    %c0_i32 = arith.constant 0 : i32
    %c0_i32_0 = arith.constant 0 : i32
    %c0_i32_1 = arith.constant 0 : i32
    return %c0_i32, %c0_i32_0 : i32, i32
  }
  func.func @transform_15(%arg0: i32) -> (i32, i32) {
    %c0_i32 = arith.constant 0 : i32
    %c0_i32_0 = arith.constant 0 : i32
    %c0_i32_1 = arith.constant 0 : i32
    return %c0_i32, %c0_i32_0 : i32, i32
  }
  func.func @transform_16(%arg0: i32) -> (i32, i32) {
    %c0_i32 = arith.constant 0 : i32
    %c0_i32_0 = arith.constant 0 : i32
    %c0_i32_1 = arith.constant 0 : i32
    return %c0_i32, %c0_i32_0 : i32, i32
  }
  func.func @transform_17(%arg0: i32) -> (i32, i32) {
    %c0_i32 = arith.constant 0 : i32
    %c0_i32_0 = arith.constant 0 : i32
    %c0_i32_1 = arith.constant 0 : i32
    return %c0_i32, %c0_i32_0 : i32, i32
  }
  func.func @transform_18(%arg0: i32) -> (i32, i32) {
    %c0_i32 = arith.constant 0 : i32
    %c0_i32_0 = arith.constant 0 : i32
    %c0_i32_1 = arith.constant 0 : i32
    return %c0_i32, %c0_i32_0 : i32, i32
  }
  func.func @transform_19(%arg0: i32) -> (i32, i32) {
    %c0_i32 = arith.constant 0 : i32
    %c0_i32_0 = arith.constant 0 : i32
    %c0_i32_1 = arith.constant 0 : i32
    return %c0_i32, %c0_i32_0 : i32, i32
  }
}

</mosaic_0001>

<bundles_post_ra>
// kernel: tpu_custom_call.1
= control target key start
LH: loop header
LB: loop body
LE: loop exit
PB: predicated region body
PF: predicated region fallthrough
CT: control target
= control target key end

     0   :  { %s1908_s0 = inlined_call_operand.vmem [shape: f32[64,16], index: 0, kind: input, shape index: {}]   ;;  %s1909_s1 = inlined_call_operand.hbm [shape: f32[16,32], index: 1, kind: input, shape index: {}]   ;;  %s1910_s2 = inlined_call_operand.vmem [shape: f32[1,32], index: 2, kind: input, shape index: {}]   ;;  %s1911_s3 = inlined_call_operand.vmem [shape: f32[32,32], index: 3, kind: input, shape index: {}]   ;;  %s1912_s4 = inlined_call_operand.vmem [shape: f32[1,32], index: 4, kind: input, shape index: {}]   ;;  %s1913_s5 = inlined_call_operand.vmem [shape: f32[32,32], index: 5, kind: input, shape index: {}]   ;;  %s1914_s6 = inlined_call_operand.vmem [shape: f32[1,32], index: 6, kind: input, shape index: {}]   ;;  %s1915_s7 = inlined_call_operand.vmem [shape: s32[32,1], index: 7, kind: input, shape index: {}]   ;;  %s1916_s8 = inlined_call_operand.vmem [shape: s32[32,1], index: 8, kind: input, shape index: {}]   ;;  %s1917_s9 = inlined_call_operand.vmem [shape: f32[32,32], index: 9, kind: input, shape index: {}]   ;;  %s1918_s10 = inlined_call_operand.vmem [shape: f32[1,32], index: 10, kind: input, shape index: {}]   ;;  %s1919_s11 = inlined_call_operand.vmem [shape: f32[1,32], index: 11, kind: input, shape index: {}]   ;;  %s1920_s12 = inlined_call_operand.vmem [shape: f32[1,32], index: 12, kind: input, shape index: {}]   ;;  %s1921_s13 = inlined_call_operand.vmem [shape: f32[32,32], index: 13, kind: input, shape index: {}]   ;;  %s1922_s14 = inlined_call_operand.vmem [shape: f32[1,32], index: 14, kind: input, shape index: {}]   ;;  %s1923_s15 = inlined_call_operand.vmem [shape: f32[1,32], index: 15, kind: input, shape index: {}]   ;;  %s1924_s16 = inlined_call_operand.vmem [shape: f32[1,32], index: 16, kind: input, shape index: {}]   ;;  %s1925_s17 = inlined_call_operand.vmem [shape: f32[1,32], index: 17, kind: input, shape index: {}]   ;;  %s1926_s18 = inlined_call_operand.<no memory space> [shape: f32[1,1], index: 18, kind: input, shape index: {}]   ;;  %s1927_s19 = inlined_call_operand.vmem [shape: f32[32,1], index: 19, kind: output, shape index: {}]  }
   0x1   :  { %1931 = sst [smem:[#allocation6_spill]] %s1908_s0  ;;  %v24_v0 = vstv %s1926_s18 }
   0x2   :  { %1932 = sst [smem:[#allocation7_spill]] %s1909_s1  ;;  %25 = vst [vmem:[#allocation2] sm:$0x1] %v24_v0 }
   0x3   :  { %1933 = sst [smem:[#allocation8_spill]] %s1910_s2 }
   0x4   :  { %1934 = sst [smem:[#allocation9_spill]] %s1911_s3 }
   0x5   :  { %26 = vsyncpa [#allocation4], 0  ;;  %s1572_s20 = smov [#allocation3]   ;;  %s1935_s2 = sld [smem:[#allocation7_spill]] }
   0x6   :  { %s34_s21 = sshll.u32 %s1572_s20, 4  ;;  %s35_s21 = int_to_ptr.vmem [resolvable:$true] %s34_s21 }
   0xb   :  { %s1548_s23 = scalar_lea.hbm %s1935_s2, 256 }
   0xc   :  { %p1549_p0 = scmp.ne.s32.totalorder %s1935_s2, %s1548_s23  ;;  %p1552_p1 = scmp.lt.u32.totalorder %s1548_s23, %s1935_s2 }
   0xe   :  { %p1554_p2 = pnand %p1552_p1, %p1549_p0 }
  0x10   :  { %1557 = shalt.err (!%p1554_p2)
}
  0x11   :  { %s1558_s18 = scalar_lea.vmem %s35_s21, 256  ;;  %p1563_p4 = scmp.lt.s32.totalorder %s35_s21, %s35_s21 }
  0x12   :  { %p1559_p3 = scmp.ne.s32.totalorder %s35_s21, %s1558_s18  ;;  %p1564_p5 = scmp.lt.s32.totalorder %s1558_s18, %s1558_s18 }
  0x14   :  { %p1565_p6 = por %p1564_p5, %p1563_p4 }
  0x16   :  { %p1566_p7 = pnand %p1565_p6, %p1559_p3 }
  0x18   :  { %1569 = shalt.err (!%p1566_p7)
}
  0x19   :  { %s1573_s27 = smov 128   ;;  %s1574_s28 = smov 8  }
  0x1a   :  { %40 = dma.hbm_to_vmem [thread:$0]  %s1935_s2, 256, %s35_s21, [#allocation4], %s1573_s27, %s1573_s27, %s1574_s28  }
  0x1b   :  { %1570 = dma.done.wait [#allocation4], 256  }
  0x1c   :  { %1571 = vsyncadd [#allocation4], 4294967040  ;;  %vm95_vm0 = vcmask 130048   ;;  %v86_v1 = vld [vmem:[#allocation3] sm:$0xff]  ;;  %v87_v2 = vld [vmem:[#allocation3 + $0x8] sm:$0xff]  ;;  %s1936_s1 = sld [smem:[#allocation6_spill]] }
  0x1d   :  { %v1457_v4 = vpack.c.bf16 %v87_v2, %v86_v1  ;;  %s1937_s24 = sld [smem:[#allocation9_spill]]  ;;  %v382_v18 = vld [vmem:[%s1913_s5] sm:$0xff]  ;;  %v383_v19 = vld [vmem:[%s1913_s5 + $0x8] sm:$0xff]  ;;  %v384_v20 = vld [vmem:[%s1913_s5 + $0x10] sm:$0xff]  ;;  %s1938_s25 = sld [smem:[#allocation8_spill]]  ;;  %vm244_vm1 = vcmask 261120  }
  0x1e   :  { %v1469_v21 = vpack.c.bf16 %v383_v19, %v382_v18  ;;  %v385_v22 = vld [vmem:[%s1913_s5 + $0x18] sm:$0xff]  ;;  %v525_v49 = vld [vmem:[%s1915_s7 + $0x8] sm:$0xff]  ;;  %v524_v50 = vld [vmem:[%s1915_s7] sm:$0xff]  ;;  %v1575_v51 = vmov 0   ;;  %v522_v19 = vlaneseq  ;;  %vm580_vm4 = vcmask 523264  }
  0x1f   :  { %1458 = vmatprep.subr.bf16.mxu0 %v1457_v4  ;;  %v1473_v23 = vpack.c.bf16 %v385_v22, %v384_v20  ;;  %1531 = vset.pattern.permute.xlu1 %v1575_v51  ;;  %v553_v52 = vld [vmem:[%s1916_s8 + $0x8] sm:$0xff]  ;;  %v552_v53 = vld [vmem:[%s1916_s8] sm:$0xff]  ;;  %v554_v54 = vld [vmem:[%s1916_s8 + $0x10] sm:$0xff]  ;;  %vm1186_vm11 = vcmask 7168  }
  0x20   :  { %1460 = vmatpush3.bf16.msra.mxu0 %v1457_v4  ;;  %1530 = vset.pattern.permute.xlu0 %v1575_v51  ;;  %v526_v55 = vld [vmem:[%s1915_s7 + $0x10] sm:$0xff]  ;;  %v555_v56 = vld [vmem:[%s1916_s8 + $0x18] sm:$0xff]  ;;  %v1205_v58 = vld [vmem:[%s1912_s4] ss:$0 sm:$0xff] }
  0x21   :  { %1470 = vmatprep.subr.bf16.mxu0 %v1469_v21  ;;  %532 = vperm.xlu1 %1531, %v525_v49   ;;  %v527_v57 = vld [vmem:[%s1915_s7 + $0x18] sm:$0xff]  ;;  %v779_v49 = vld [vmem:[%s1917_s9] sm:$0xff] }
  0x22   :  { %v78_v3 = vld [vmem:[%s1936_s1] sm:$0xff]  ;;  %v79_v7 = vld [vmem:[%s1936_s1 + $0x8] sm:$0xff]  ;;  %v80_v9 = vld [vmem:[%s1936_s1 + $0x10] sm:$0xff]  ;;  %529 = vperm.xlu0 %1530, %v524_v50  }
  0x23   :  { %1333 = vmatprep.mubr.msk.f32.mxu0 %vm95_vm0, %v78_v3  ;;  %v233_v5 = vld [vmem:[%s1937_s24] sm:$0xff]  ;;  %v234_v6 = vld [vmem:[%s1937_s24 + $0x8] sm:$0xff]  ;;  %v81_v10 = vld [vmem:[%s1936_s1 + $0x18] sm:$0xff] }
  0x24   :  { %v1461_v8 = vpack.c.bf16 %v234_v6, %v233_v5  ;;  %1334 = vmatmul.mubr.msk.f32.vlgmr.msra.gmra.mrb[0].mxu0 %vm95_vm0, %v79_v7  ;;  %v82_v11 = vld [vmem:[%s1936_s1 + $0x20] sm:$0xff]  ;;  %v83_v12 = vld [vmem:[%s1936_s1 + $0x28] sm:$0xff]  ;;  %v84_v13 = vld [vmem:[%s1936_s1 + $0x30] sm:$0xff] }
  0x25   :  { %1336 = vmatprep.mubr.msk.f32.mxu0 %vm95_vm0, %v80_v9  ;;  %v85_v14 = vld [vmem:[%s1936_s1 + $0x38] sm:$0xff]  ;;  %v235_v15 = vld [vmem:[%s1937_s24 + $0x10] sm:$0xff]  ;;  %1472 = vmatpush3.bf16.msra.mxu0 %v1469_v21  ;;  %v1196_v24 = vld [vmem:[%s1938_s25] ss:$0 sm:$0xff]  ;;  %v1794_v21 = vand.u32 127, %v522_v19 }
  0x26   :  { %1462 = vmatprep.subr.bf16.mxu1 %v1461_v8  ;;  %v236_v16 = vld [vmem:[%s1937_s24 + $0x18] sm:$0xff]  ;;  %1474 = vmatprep.subr.bf16.mxu0 %v1473_v23  ;;  %v780_v50 = vld [vmem:[%s1917_s9 + $0x8] sm:$0xff] }
  0x27   :  { %1464 = vmatpush3.bf16.msra.mxu1 %v1461_v8  ;;  %v1465_v17 = vpack.c.bf16 %v236_v16, %v235_v15  ;;  %560 = vperm.xlu1 %1531, %v553_v52  }
  0x28   :  { %1337 = vmatmul.mubr.msk.f32.gmra.mrb[2].mxu0 %vm95_vm0, %v81_v10  ;;  %557 = vperm.xlu0 %1530, %v552_v53   ;;  %v1509_v53 = vpack.c.bf16 %v780_v50, %v779_v49  ;;  %v968_v49 = vld [vmem:[%s1921_s13 + $0x10] sm:$0xff]  ;;  %v969_v50 = vld [vmem:[%s1921_s13 + $0x18] sm:$0xff] }
  0x29   :  { %1339 = vmatprep.mubr.msk.f32.mxu0 %vm95_vm0, %v82_v11  ;;  %1466 = vmatprep.subr.bf16.mxu1 %v1465_v17 }
  0x2a   :  { %1476 = vmatpush3.bf16.msra.mxu0 %v1473_v23  ;;  %v1576_v23 = vmov 0.0  }
  0x2b   :  { %1468 = vmatpush3.bf16.msra.mxu1 %v1465_v17  ;;  %563 = vperm.xlu1 %1531, %v554_v54  }
  0x2c   :  { %1340 = vmatmul.mubr.msk.f32.gmra.mrb[4].mxu0 %vm95_vm0, %v83_v12  ;;  %535 = vperm.xlu0 %1530, %v526_v55  }
  0x2d   :  { %1342 = vmatprep.mubr.msk.f32.mxu0 %vm95_vm0, %v84_v13 }
  0x2f   :  { %566 = vperm.xlu1 %1531, %v555_v56  }
  0x30   :  { %1343 = vmatmul.mubr.msk.f32.gmra.mrb[6].mxu0 %vm95_vm0, %v85_v14  ;;  %538 = vperm.xlu0 %1530, %v527_v57  }
  0xa1   :  { %v530_v20 = vpop.permute.xlu0 %529 }
  0xa2   :  { %vm540_vm2 = vcmp.eq.s32.totalorder %v1794_v21, %v530_v20 }
  0xa7   :  { %v558_v22 = vpop.permute.xlu0 %557 }
  0xa8   :  { %vm568_vm3 = vcmp.eq.s32.totalorder %v1794_v21, %v558_v22 }
  0xf7   :  { %v1335_v25 = vpop.f32.mrb[0].mxu0 }
  0xf8   :  { %v192_v26 = vadd.f32 %v1335_v25, %v1196_v24  ;;  %v186_v27 = vpop.f32.mrb[1].mxu0  ;;  %v1227_v25 = vsel %vm568_vm3, 1.0, %v1576_v23 }
  0xf9   :  { %v187_v28 = vadd.f32 %v1196_v24, %v186_v27  ;;  %v533_v27 = vpop.permute.xlu1 %532 }
  0xfa   :  { %v226_v31 = vmax.f32 %v192_v26, 0.0  ;;  %v1214_v26 = vld [vmem:[%s1914_s6] ss:$0 sm:$0xff]  ;;  %vm541_vm5 = vcmp.eq.s32.totalorder %v1794_v21, %v533_v27 }
  0xfb   :  { %v225_v29 = vmax.f32 %v187_v28, 0.0  ;;  %v1338_v30 = vpop.f32.mrb[2].mxu0  ;;  %v1224_v56 = vsel %vm541_vm5, 1.0, %v1576_v23 }
  0xfc   :  { %v202_v32 = vadd.f32 %v1338_v30, %v1196_v24  ;;  %v196_v33 = vpop.f32.mrb[3].mxu0 }
  0xfd   :  { %v197_v34 = vadd.f32 %v1196_v24, %v196_v33  ;;  %1353 = vmatprep.mubr.msk.f32.mxu1 %vm244_vm1, %v225_v29 }
  0xfe   :  { %1354 = vmatmul.mubr.msk.f32.vlgmr.msra.gmra.mrb[0].mxu1 %vm244_vm1, %v226_v31  ;;  %v228_v37 = vmax.f32 %v202_v32, 0.0 }
  0xff   :  { %v227_v35 = vmax.f32 %v197_v34, 0.0  ;;  %v1341_v36 = vpop.f32.mrb[4].mxu0 }
 0x100   :  { %v212_v38 = vadd.f32 %v1341_v36, %v1196_v24  ;;  %v206_v39 = vpop.f32.mrb[5].mxu0  ;;  %v561_v36 = vpop.permute.xlu1 %560 }
 0x101   :  { %v207_v40 = vadd.f32 %v1196_v24, %v206_v39  ;;  %1356 = vmatprep.mubr.msk.f32.mxu1 %vm244_vm1, %v227_v35  ;;  %vm569_vm6 = vcmp.eq.s32.totalorder %v1794_v21, %v561_v36 }
 0x102   :  { %1357 = vmatmul.mubr.msk.f32.gmra.mrb[2].mxu1 %vm244_vm1, %v228_v37  ;;  %v230_v43 = vmax.f32 %v212_v38, 0.0  ;;  %v1228_v57 = vsel %vm569_vm6, 1.0, %v1576_v23 }
 0x103   :  { %v229_v41 = vmax.f32 %v207_v40, 0.0  ;;  %v1344_v42 = vpop.f32.mrb[6].mxu0 }
 0x104   :  { %v222_v44 = vadd.f32 %v1344_v42, %v1196_v24  ;;  %v216_v45 = vpop.f32.mrb[7].mxu0 }
 0x105   :  { %v217_v46 = vadd.f32 %v1196_v24, %v216_v45  ;;  %1359 = vmatprep.mubr.msk.f32.mxu1 %vm244_vm1, %v229_v41  ;;  %v1223_v24 = vsel %vm540_vm2, 1.0, %v1576_v23 }
 0x106   :  { %1360 = vmatmul.mubr.msk.f32.gmra.mrb[4].mxu1 %vm244_vm1, %v230_v43  ;;  %v232_v48 = vmax.f32 %v222_v44, 0.0  ;;  %v564_v43 = vpop.permute.xlu1 %563 }
 0x107   :  { %v231_v47 = vmax.f32 %v217_v46, 0.0  ;;  %v536_v46 = vpop.permute.xlu0 %535  ;;  %vm570_vm7 = vcmp.eq.s32.totalorder %v1794_v21, %v564_v43 }
 0x108   :  { %vm542_vm8 = vcmp.eq.s32.totalorder %v1794_v21, %v536_v46  ;;  %v966_v46 = vld [vmem:[%s1921_s13] sm:$0xff] }
 0x109   :  { %1362 = vmatprep.mubr.msk.f32.mxu1 %vm244_vm1, %v231_v47 }
 0x10a   :  { %1363 = vmatmul.mubr.msk.f32.gmra.mrb[6].mxu1 %vm244_vm1, %v232_v48  ;;  %v567_v54 = vpop.permute.xlu1 %566 }
 0x10b   :  { %1401 = vmatprep.mubr.msk.f32.mxu1 %vm580_vm4, %v1223_v24  ;;  %v539_v55 = vpop.permute.xlu0 %538  ;;  %vm571_vm9 = vcmp.eq.s32.totalorder %v1794_v21, %v567_v54 }
 0x10c   :  { %vm543_vm10 = vcmp.eq.s32.totalorder %v1794_v21, %v539_v55 }
 0x1d1   :  { %v1355_v59 = vpop.f32.mrb[0].mxu1 }
 0x1d2   :  { %v341_v60 = vadd.f32 %v1355_v59, %v1205_v58  ;;  %v335_v61 = vpop.f32.mrb[1].mxu1  ;;  %v1225_v59 = vsel %vm542_vm8, 1.0, %v1576_v23 }
 0x1d3   :  { %v336_v62 = vadd.f32 %v1205_v58, %v335_v61  ;;  %v1226_v61 = vsel %vm543_vm10, 1.0, %v1576_v23 }
 0x1d4   :  { %v375_v1 = vmax.f32 %v341_v60, 0.0  ;;  %v1230_v60 = vsel %vm571_vm9, 1.0, %v1576_v23 }
 0x1d5   :  { %v374_v63 = vmax.f32 %v336_v62, 0.0  ;;  %v1358_v0 = vpop.f32.mrb[2].mxu1  ;;  %v781_v62 = vld [vmem:[%s1917_s9 + $0x10] sm:$0xff] }
 0x1d6   :  { %v351_v2 = vadd.f32 %v1358_v0, %v1205_v58  ;;  %v345_v3 = vpop.f32.mrb[3].mxu1 }
 0x1d7   :  { %v346_v4 = vadd.f32 %v1205_v58, %v345_v3  ;;  %1373 = vmatprep.mubr.msk.f32.mxu0 %vm244_vm1, %v374_v63  ;;  %v782_v63 = vld [vmem:[%s1917_s9 + $0x18] sm:$0xff] }
 0x1d8   :  { %1374 = vmatmul.mubr.msk.f32.vlgmr.msra.gmra.mrb[8].mxu0 %vm244_vm1, %v375_v1  ;;  %v377_v7 = vmax.f32 %v351_v2, 0.0  ;;  %v1513_v0 = vpack.c.bf16 %v782_v63, %v781_v62 }
 0x1d9   :  { %v376_v5 = vmax.f32 %v346_v4, 0.0  ;;  %v1361_v6 = vpop.f32.mrb[4].mxu1 }
 0x1da   :  { %v361_v8 = vadd.f32 %v1361_v6, %v1205_v58  ;;  %v355_v9 = vpop.f32.mrb[5].mxu1 }
 0x1db   :  { %v356_v10 = vadd.f32 %v1205_v58, %v355_v9  ;;  %1376 = vmatprep.mubr.msk.f32.mxu0 %vm244_vm1, %v376_v5 }
 0x1dc   :  { %1377 = vmatmul.mubr.msk.f32.gmra.mrb[10].mxu0 %vm244_vm1, %v377_v7  ;;  %v379_v13 = vmax.f32 %v361_v8, 0.0 }
 0x1dd   :  { %v378_v11 = vmax.f32 %v356_v10, 0.0  ;;  %v1364_v12 = vpop.f32.mrb[6].mxu1 }
 0x1de   :  { %v371_v14 = vadd.f32 %v1364_v12, %v1205_v58  ;;  %v365_v15 = vpop.f32.mrb[7].mxu1 }
 0x1df   :  { %v366_v16 = vadd.f32 %v1205_v58, %v365_v15  ;;  %1379 = vmatprep.mubr.msk.f32.mxu0 %vm244_vm1, %v378_v11  ;;  %v1229_v58 = vsel %vm570_vm7, 1.0, %v1576_v23 }
 0x1e0   :  { %1380 = vmatmul.mubr.msk.f32.gmra.mrb[12].mxu0 %vm244_vm1, %v379_v13  ;;  %v381_v18 = vmax.f32 %v371_v14, 0.0  ;;  %v1239_v13 = vld [vmem:[%s1918_s10] ss:$0 sm:$0xff] }
 0x1e1   :  { %v380_v17 = vmax.f32 %v366_v16, 0.0 }
 0x1e3   :  { %1382 = vmatprep.mubr.msk.f32.mxu0 %vm244_vm1, %v380_v17 }
 0x1e4   :  { %1383 = vmatmul.mubr.msk.f32.gmra.mrb[14].mxu0 %vm244_vm1, %v381_v18 }
 0x1e5   :  { %1423 = vmatprep.mubr.msk.f32.mxu0 %vm580_vm4, %v1227_v25 }
 0x2ab   :  { %v1375_v28 = vpop.f32.mrb[8].mxu0 }
 0x2ac   :  { %v489_v29 = vadd.f32 %v1375_v28, %v1214_v26  ;;  %v483_v30 = vpop.f32.mrb[9].mxu0 }
 0x2ad   :  { %v484_v31 = vadd.f32 %v1214_v26, %v483_v30 }
 0x2af   :  { %v1477_v32 = vpack.c.bf16 %v489_v29, %v484_v31  ;;  %v1378_v33 = vpop.f32.mrb[10].mxu0 }
 0x2b0   :  { %v499_v34 = vadd.f32 %v1378_v33, %v1214_v26  ;;  %v493_v35 = vpop.f32.mrb[11].mxu0 }
 0x2b1   :  { %v494_v37 = vadd.f32 %v1214_v26, %v493_v35  ;;  %1478 = vmatprep.subr.bf16.mxu1 %v1477_v32  ;;  %1494 = vmatprep.subr.bf16.mxu0 %v1477_v32 }
 0x2b2   :  { %1480 = vmatpush3.bf16.msra.mxu1 %v1477_v32  ;;  %1496 = vmatpush3.bf16.msra.mxu0 %v1477_v32 }
 0x2b3   :  { %v1481_v38 = vpack.c.bf16 %v499_v34, %v494_v37  ;;  %v1381_v39 = vpop.f32.mrb[12].mxu0 }
 0x2b4   :  { %v509_v40 = vadd.f32 %v1381_v39, %v1214_v26  ;;  %v503_v41 = vpop.f32.mrb[13].mxu0 }
 0x2b5   :  { %v504_v42 = vadd.f32 %v1214_v26, %v503_v41  ;;  %1482 = vmatprep.subr.bf16.mxu1 %v1481_v38  ;;  %1498 = vmatprep.subr.bf16.mxu0 %v1481_v38 }
 0x2b6   :  { %1484 = vmatpush3.bf16.msra.mxu1 %v1481_v38  ;;  %1500 = vmatpush3.bf16.msra.mxu0 %v1481_v38 }
 0x2b7   :  { %v1485_v44 = vpack.c.bf16 %v509_v40, %v504_v42  ;;  %v1384_v45 = vpop.f32.mrb[14].mxu0 }
 0x2b8   :  { %v519_v47 = vadd.f32 %v1384_v45, %v1214_v26  ;;  %v513_v48 = vpop.f32.mrb[15].mxu0 }
 0x2b9   :  { %v514_v51 = vadd.f32 %v1214_v26, %v513_v48  ;;  %1486 = vmatprep.subr.bf16.mxu1 %v1485_v44  ;;  %1502 = vmatprep.subr.bf16.mxu0 %v1485_v44 }
 0x2ba   :  { %1488 = vmatpush3.bf16.msra.mxu1 %v1485_v44  ;;  %1504 = vmatpush3.bf16.msra.mxu0 %v1485_v44 }
 0x2bb   :  { %v1489_v52 = vpack.c.bf16 %v519_v47, %v514_v51  ;;  %v967_v47 = vld [vmem:[%s1921_s13 + $0x8] sm:$0xff]  ;;  %v1521_v51 = vpack.c.bf16 %v969_v50, %v968_v49 }
 0x2bc   :  { %v1517_v48 = vpack.c.bf16 %v967_v47, %v966_v46 }
 0x2bd   :  { %1490 = vmatprep.subr.bf16.mxu1 %v1489_v52  ;;  %1506 = vmatprep.subr.bf16.mxu0 %v1489_v52 }
 0x2be   :  { %1492 = vmatpush3.bf16.msra.mxu1 %v1489_v52  ;;  %1508 = vmatpush3.bf16.msra.mxu0 %v1489_v52 }
 0x2bf   :  { %1510 = vmatprep.subr.bf16.mxu1 %v1509_v53 }
 0x2c1   :  { %1402 = vmatmul.mubr.msk.f32.vlgmr.msra.gmra.mrb[8].mxu1 %vm580_vm4, %v1224_v56  ;;  %1424 = vmatmul.mubr.msk.f32.vlgmr.msra.gmra.mrb[16].mxu0 %vm580_vm4, %v1228_v57 }
 0x2c2   :  { %1404 = vmatprep.mubr.msk.f32.mxu1 %vm580_vm4, %v1225_v59  ;;  %1426 = vmatprep.mubr.msk.f32.mxu0 %vm580_vm4, %v1229_v58 }
 0x2c3   :  { %1512 = vmatpush3.bf16.msra.mxu1 %v1509_v53 }
 0x2c4   :  { %1514 = vmatprep.subr.bf16.mxu1 %v1513_v0 }
 0x2c5   :  { %1405 = vmatmul.mubr.msk.f32.gmra.mrb[10].mxu1 %vm580_vm4, %v1226_v61  ;;  %1427 = vmatmul.mubr.msk.f32.gmra.mrb[18].mxu0 %vm580_vm4, %v1230_v60 }
 0x2c7   :  { %1516 = vmatpush3.bf16.msra.mxu1 %v1513_v0 }
 0x2c8   :  { %1518 = vmatprep.subr.bf16.mxu1 %v1517_v48 }
 0x394   :  { %v1403_v1 = vpop.f32.mrb[8].mxu1  ;;  %v1425_v2 = vpop.f32.mrb[16].mxu0 }
 0x395   :  { %v776_v3 = vmul.f32 %v1425_v2, %v1403_v1  ;;  %v659_v4 = vpop.f32.mrb[9].mxu1  ;;  %v756_v5 = vpop.f32.mrb[17].mxu0  ;;  %v1244_v1 = vld [vmem:[%s1919_s11] ss:$0 sm:$0xff] }
 0x396   :  { %v775_v6 = vmul.f32 %v756_v5, %v659_v4  ;;  %v1245_v4 = vld [vmem:[%s1920_s12] ss:$0 sm:$0xff] }
 0x398   :  { %v1406_v7 = vpop.f32.mrb[10].mxu1  ;;  %v1428_v8 = vpop.f32.mrb[18].mxu0  ;;  %1437 = vmatprep.mubr.msk.f32.mxu1 %vm244_vm1, %v775_v6 }
 0x399   :  { %v778_v9 = vmul.f32 %v1428_v8, %v1406_v7  ;;  %v669_v10 = vpop.f32.mrb[11].mxu1  ;;  %v766_v11 = vpop.f32.mrb[19].mxu0  ;;  %1438 = vmatmul.mubr.msk.f32.vlgmr.msra.gmra.mrb[12].mxu1 %vm244_vm1, %v776_v3 }
 0x39a   :  { %v777_v12 = vmul.f32 %v766_v11, %v669_v10  ;;  %1520 = vmatpush3.bf16.msra.mxu1 %v1517_v48 }
 0x39b   :  { %1522 = vmatprep.subr.bf16.mxu1 %v1521_v51 }
 0x39c   :  { %1440 = vmatprep.mubr.msk.f32.mxu1 %vm244_vm1, %v777_v12 }
 0x39d   :  { %1441 = vmatmul.mubr.msk.f32.gmra.mrb[14].mxu1 %vm244_vm1, %v778_v9 }
 0x39e   :  { %1524 = vmatpush3.bf16.msra.mxu1 %v1521_v51 }
 0x46c   :  { %v1439_v14 = vpop.f32.mrb[12].mxu1 }
 0x46d   :  { %v874_v15 = vadd.f32 %v1439_v14, %v1239_v13  ;;  %v868_v16 = vpop.f32.mrb[13].mxu1 }
 0x46e   :  { %v869_v17 = vadd.f32 %v1239_v13, %v868_v16 }
 0x46f   :  { %v892_v18 = vsel %vm244_vm1, %v874_v15, 0.0 }
 0x470   :  { %893 = vadd.xlane.f32.xlu1 %v892_v18  ;;  %v1442_v19 = vpop.f32.mrb[14].mxu1  ;;  %v889_v20 = vsel %vm244_vm1, %v869_v17, 0.0 }
 0x471   :  { %890 = vadd.xlane.f32.xlu0 %v889_v20  ;;  %v878_v21 = vpop.f32.mrb[15].mxu1  ;;  %v884_v23 = vadd.f32 %v1442_v19, %v1239_v13 }
 0x472   :  { %v879_v22 = vadd.f32 %v1239_v13, %v878_v21 }
 0x473   :  { %v898_v25 = vsel %vm244_vm1, %v884_v23, 0.0 }
 0x474   :  { %v895_v24 = vsel %vm244_vm1, %v879_v22, 0.0 }
 0x475   :  { %896 = vadd.xlane.f32.xlu0 %v895_v24 }
 0x479   :  { %899 = vadd.xlane.f32.xlu0 %v898_v25 }
 0x4fd   :  { %v894_v26 = vpop.xlane.xlu1 %893 }
 0x4fe   :  { %v903_v27 = vmul.f32 0.03125, %v894_v26  ;;  %v891_v28 = vpop.xlane.xlu0 %890 }
 0x4ff   :  { %v902_v29 = vmul.f32 0.03125, %v891_v28 }
 0x500   :  { %v907_v30 = vsub.f32 %v874_v15, %v903_v27 }
 0x501   :  { %v906_v31 = vsub.f32 %v869_v17, %v902_v29 }
 0x502   :  { %v897_v32 = vpop.xlane.xlu0 %896  ;;  %v911_v33 = vmul.f32 %v907_v30, %v907_v30 }
 0x503   :  { %v904_v34 = vmul.f32 0.03125, %v897_v32  ;;  %v910_v35 = vmul.f32 %v906_v31, %v906_v31 }
 0x504   :  { %v917_v36 = vsel %vm244_vm1, %v911_v33, 0.0 }
 0x505   :  { %v908_v37 = vsub.f32 %v879_v22, %v904_v34  ;;  %918 = vadd.xlane.f32.xlu0 %v917_v36  ;;  %v914_v38 = vsel %vm244_vm1, %v910_v35, 0.0  ;;  %v1246_v22 = vld [vmem:[%s1922_s14] ss:$0 sm:$0xff] }
 0x506   :  { %915 = vadd.xlane.f32.xlu1 %v914_v38  ;;  %v900_v39 = vpop.xlane.xlu0 %899 }
 0x507   :  { %v905_v40 = vmul.f32 0.03125, %v900_v39  ;;  %v912_v41 = vmul.f32 %v908_v37, %v908_v37 }
 0x509   :  { %v909_v42 = vsub.f32 %v884_v23, %v905_v40  ;;  %v920_v43 = vsel %vm244_vm1, %v912_v41, 0.0 }
 0x50a   :  { %921 = vadd.xlane.f32.xlu1 %v920_v43 }
 0x50b   :  { %v913_v44 = vmul.f32 %v909_v42, %v909_v42 }
 0x50d   :  { %v923_v45 = vsel %vm244_vm1, %v913_v44, 0.0 }
 0x50e   :  { %924 = vadd.xlane.f32.xlu0 %v923_v45 }
 0x592   :  { %v919_v52 = vpop.xlane.xlu0 %918 }
 0x593   :  { %v927_v53 = vmul.f32 0.03125, %v919_v52  ;;  %v916_v54 = vpop.xlane.xlu1 %915 }
 0x594   :  { %v926_v55 = vmul.f32 0.03125, %v916_v54 }
 0x595   :  { %v931_v56 = vadd.f32 1e-05, %v927_v53 }
 0x596   :  { %v930_v57 = vadd.f32 1e-05, %v926_v55 }
 0x597   :  { %1532 = vrsqrt.f32 %v931_v56  ;;  %v922_v58 = vpop.xlane.xlu1 %921 }
 0x598   :  { %1534 = vrsqrt.f32 %v930_v57  ;;  %v928_v59 = vmul.f32 0.03125, %v922_v58 }
 0x59a   :  { %v932_v60 = vadd.f32 1e-05, %v928_v59 }
 0x59b   :  { %v925_v61 = vpop.xlane.xlu0 %924 }
 0x59c   :  { %1536 = vrsqrt.f32 %v932_v60  ;;  %v929_v62 = vmul.f32 0.03125, %v925_v61 }
 0x59e   :  { %v933_v63 = vadd.f32 1e-05, %v929_v62 }
 0x5a0   :  { %1538 = vrsqrt.f32 %v933_v63 }
 0x5a1   :  { %v1533_v0 = vpop.eup %1532 }
 0x5a2   :  { %v1535_v2 = vpop.eup %1534  ;;  %v939_v3 = vmul.f32 %v1533_v0, %v907_v30 }
 0x5a3   :  { %v938_v5 = vmul.f32 %v1535_v2, %v906_v31 }
 0x5a4   :  { %v949_v6 = vmul.f32 %v1244_v1, %v939_v3 }
 0x5a5   :  { %v948_v7 = vmul.f32 %v1244_v1, %v938_v5 }
 0x5a6   :  { %v1537_v8 = vpop.eup %1536  ;;  %v959_v9 = vadd.f32 %v1245_v4, %v949_v6 }
 0x5a7   :  { %v958_v10 = vadd.f32 %v1245_v4, %v948_v7  ;;  %v940_v11 = vmul.f32 %v1537_v8, %v908_v37  ;;  %v1252_v7 = vld [vmem:[%s1924_s16] ss:$0 sm:$0xff] }
 0x5a8   :  { %v963_v15 = vmax.f32 %v959_v9, 0.0 }
 0x5a9   :  { %v962_v12 = vmax.f32 %v958_v10, 0.0  ;;  %v950_v13 = vmul.f32 %v1244_v1, %v940_v11 }
 0x5aa   :  { %v1539_v14 = vpop.eup %1538 }
 0x5ab   :  { %1451 = vmatprep.mubr.msk.f32.mxu1 %vm244_vm1, %v962_v12  ;;  %v960_v16 = vadd.f32 %v1245_v4, %v950_v13  ;;  %v941_v17 = vmul.f32 %v1539_v14, %v909_v42  ;;  %v1253_v12 = vld [vmem:[%s1925_s17] ss:$0 sm:$0xff] }
 0x5ac   :  { %1452 = vmatmul.mubr.msk.f32.vlgmr.msra.gmra.mrb[16].mxu1 %vm244_vm1, %v963_v15 }
 0x5ad   :  { %v964_v18 = vmax.f32 %v960_v16, 0.0  ;;  %v951_v19 = vmul.f32 %v1244_v1, %v941_v17 }
 0x5af   :  { %1454 = vmatprep.mubr.msk.f32.mxu1 %vm244_vm1, %v964_v18  ;;  %v961_v20 = vadd.f32 %v1245_v4, %v951_v19  ;;  %v1251_v4 = vld [vmem:[%s1923_s15] ss:$0 sm:$0xff] }
 0x5b1   :  { %v965_v21 = vmax.f32 %v961_v20, 0.0 }
 0x5b3   :  { %1455 = vmatmul.mubr.msk.f32.gmra.mrb[18].mxu1 %vm244_vm1, %v965_v21 }
 0x67f   :  { %v1453_v23 = vpop.f32.mrb[16].mxu1 }
 0x680   :  { %v1061_v24 = vadd.f32 %v1453_v23, %v1246_v22  ;;  %v1055_v25 = vpop.f32.mrb[17].mxu1 }
 0x681   :  { %v1056_v26 = vadd.f32 %v1246_v22, %v1055_v25 }
 0x682   :  { %v1079_v27 = vsel %vm244_vm1, %v1061_v24, 0.0 }
 0x683   :  { %1080 = vadd.xlane.f32.xlu0 %v1079_v27  ;;  %v1076_v28 = vsel %vm244_vm1, %v1056_v26, 0.0 }
 0x684   :  { %1077 = vadd.xlane.f32.xlu1 %v1076_v28 }
 0x686   :  { %v1456_v29 = vpop.f32.mrb[18].mxu1 }
 0x687   :  { %v1071_v30 = vadd.f32 %v1456_v29, %v1246_v22  ;;  %v1065_v31 = vpop.f32.mrb[19].mxu1 }
 0x688   :  { %v1066_v32 = vadd.f32 %v1246_v22, %v1065_v31 }
 0x689   :  { %v1085_v33 = vsel %vm244_vm1, %v1071_v30, 0.0 }
 0x68a   :  { %1086 = vadd.xlane.f32.xlu0 %v1085_v33  ;;  %v1082_v34 = vsel %vm244_vm1, %v1066_v32, 0.0 }
 0x68b   :  { %1083 = vadd.xlane.f32.xlu1 %v1082_v34  ;;  %v1254_v34 = vld [vmem:[#allocation2] ss:$0 sm:$0xff] }
 0x710   :  { %v1081_v35 = vpop.xlane.xlu0 %1080 }
 0x711   :  { %v1089_v36 = vmul.f32 0.03125, %v1081_v35  ;;  %v1078_v37 = vpop.xlane.xlu1 %1077 }
 0x712   :  { %v1088_v38 = vmul.f32 0.03125, %v1078_v37 }
 0x713   :  { %v1093_v39 = vsub.f32 %v1061_v24, %v1089_v36 }
 0x714   :  { %v1092_v40 = vsub.f32 %v1056_v26, %v1088_v38 }
 0x715   :  { %v1097_v41 = vmul.f32 %v1093_v39, %v1093_v39 }
 0x716   :  { %v1096_v42 = vmul.f32 %v1092_v40, %v1092_v40 }
 0x717   :  { %v1087_v43 = vpop.xlane.xlu0 %1086  ;;  %v1103_v44 = vsel %vm244_vm1, %v1097_v41, 0.0 }
 0x718   :  { %v1091_v45 = vmul.f32 0.03125, %v1087_v43  ;;  %v1084_v46 = vpop.xlane.xlu1 %1083  ;;  %1104 = vadd.xlane.f32.xlu0 %v1103_v44  ;;  %v1100_v47 = vsel %vm244_vm1, %v1096_v42, 0.0 }
 0x719   :  { %v1090_v48 = vmul.f32 0.03125, %v1084_v46  ;;  %1101 = vadd.xlane.f32.xlu1 %v1100_v47 }
 0x71a   :  { %v1095_v49 = vsub.f32 %v1071_v30, %v1091_v45 }
 0x71b   :  { %v1094_v50 = vsub.f32 %v1066_v32, %v1090_v48 }
 0x71c   :  { %v1099_v51 = vmul.f32 %v1095_v49, %v1095_v49 }
 0x71d   :  { %v1098_v52 = vmul.f32 %v1094_v50, %v1094_v50 }
 0x71e   :  { %v1109_v53 = vsel %vm244_vm1, %v1099_v51, 0.0 }
 0x71f   :  { %1110 = vadd.xlane.f32.xlu0 %v1109_v53  ;;  %v1106_v54 = vsel %vm244_vm1, %v1098_v52, 0.0 }
 0x720   :  { %1107 = vadd.xlane.f32.xlu1 %v1106_v54 }
 0x7a5   :  { %v1105_v55 = vpop.xlane.xlu0 %1104 }
 0x7a6   :  { %v1113_v56 = vmul.f32 0.03125, %v1105_v55  ;;  %v1102_v57 = vpop.xlane.xlu1 %1101 }
 0x7a7   :  { %v1112_v58 = vmul.f32 0.03125, %v1102_v57 }
 0x7a8   :  { %v1117_v59 = vadd.f32 1e-05, %v1113_v56 }
 0x7a9   :  { %v1116_v60 = vadd.f32 1e-05, %v1112_v58 }
 0x7aa   :  { %1540 = vrsqrt.f32 %v1117_v59 }
 0x7ab   :  { %1542 = vrsqrt.f32 %v1116_v60 }
 0x7ac   :  { %v1111_v61 = vpop.xlane.xlu0 %1110 }
 0x7ad   :  { %v1115_v62 = vmul.f32 0.03125, %v1111_v61  ;;  %v1108_v63 = vpop.xlane.xlu1 %1107 }
 0x7ae   :  { %v1114_v0 = vmul.f32 0.03125, %v1108_v63 }
 0x7af   :  { %v1119_v1 = vadd.f32 1e-05, %v1115_v62 }
 0x7b0   :  { %v1118_v2 = vadd.f32 1e-05, %v1114_v0 }
 0x7b1   :  { %1544 = vrsqrt.f32 %v1119_v1 }
 0x7b2   :  { %1546 = vrsqrt.f32 %v1118_v2 }
 0x7b4   :  { %v1541_v3 = vpop.eup %1540 }
 0x7b5   :  { %v1543_v5 = vpop.eup %1542  ;;  %v1125_v6 = vmul.f32 %v1541_v3, %v1093_v39 }
 0x7b6   :  { %v1124_v8 = vmul.f32 %v1543_v5, %v1092_v40 }
 0x7b7   :  { %v1135_v9 = vmul.f32 %v1251_v4, %v1125_v6 }
 0x7b8   :  { %v1134_v10 = vmul.f32 %v1251_v4, %v1124_v8 }
 0x7b9   :  { %v1145_v11 = vadd.f32 %v1252_v7, %v1135_v9 }
 0x7ba   :  { %v1144_v13 = vadd.f32 %v1252_v7, %v1134_v10 }
 0x7bb   :  { %v1545_v14 = vpop.eup %1544  ;;  %v1149_v15 = vmax.f32 %v1145_v11, 0.0 }
 0x7bc   :  { %v1547_v16 = vpop.eup %1546  ;;  %v1148_v17 = vmax.f32 %v1144_v13, 0.0  ;;  %v1127_v18 = vmul.f32 %v1545_v14, %v1095_v49 }
 0x7bd   :  { %v1160_v19 = vmul.f32 %v1253_v12, %v1149_v15  ;;  %v1126_v20 = vmul.f32 %v1547_v16, %v1094_v50 }
 0x7be   :  { %v1159_v21 = vmul.f32 %v1253_v12, %v1148_v17  ;;  %v1137_v22 = vmul.f32 %v1251_v4, %v1127_v18 }
 0x7bf   :  { %v1166_v23 = vsel %vm244_vm1, %v1160_v19, 0.0  ;;  %v1136_v24 = vmul.f32 %v1251_v4, %v1126_v20 }
 0x7c0   :  { %1167 = vadd.xlane.f32.xlu0 %v1166_v23  ;;  %v1163_v25 = vsel %vm244_vm1, %v1159_v21, 0.0  ;;  %v1147_v26 = vadd.f32 %v1252_v7, %v1137_v22 }
 0x7c1   :  { %1164 = vadd.xlane.f32.xlu1 %v1163_v25  ;;  %v1146_v27 = vadd.f32 %v1252_v7, %v1136_v24 }
 0x7c2   :  { %v1151_v28 = vmax.f32 %v1147_v26, 0.0 }
 0x7c3   :  { %v1150_v29 = vmax.f32 %v1146_v27, 0.0 }
 0x7c4   :  { %v1162_v30 = vmul.f32 %v1253_v12, %v1151_v28 }
 0x7c5   :  { %v1161_v31 = vmul.f32 %v1253_v12, %v1150_v29 }
 0x7c6   :  { %v1172_v32 = vsel %vm244_vm1, %v1162_v30, 0.0 }
 0x7c7   :  { %1173 = vadd.xlane.f32.xlu0 %v1172_v32  ;;  %v1169_v33 = vsel %vm244_vm1, %v1161_v31, 0.0 }
 0x7c8   :  { %1170 = vadd.xlane.f32.xlu1 %v1169_v33 }
 0x84d   :  { %v1168_v35 = vpop.xlane.xlu0 %1167 }
 0x84e   :  { %v1183_v36 = vadd.f32 %v1254_v34, %v1168_v35  ;;  %v1165_v37 = vpop.xlane.xlu1 %1164 }
 0x84f   :  { %v1182_v38 = vadd.f32 %v1254_v34, %v1165_v37 }
 0x850   :  { %1188 = vst.msk [vmem:[%s1927_s19 + $0x8] sm:$0xff] %vm1186_vm11, %v1183_v36 }
 0x851   :  { %1187 = vst.msk [vmem:[%s1927_s19] sm:$0xff] %vm1186_vm11, %v1182_v38 }
 0x854   :  { %v1174_v39 = vpop.xlane.xlu0 %1173 }
 0x855   :  { %v1185_v40 = vadd.f32 %v1254_v34, %v1174_v39  ;;  %v1171_v41 = vpop.xlane.xlu1 %1170 }
 0x856   :  { %v1184_v42 = vadd.f32 %v1254_v34, %v1171_v41 }
 0x857   :  { %1190 = vst.msk [vmem:[%s1927_s19 + $0x18] sm:$0xff] %vm1186_vm11, %v1185_v40 }
 0x858   :  { %1189 = vst.msk [vmem:[%s1927_s19 + $0x10] sm:$0xff] %vm1186_vm11, %v1184_v42 }
 0x859   :  { %1195 = vsyncpa [#allocation4], 1 }

</bundles_post_ra>
